<compile_context>
chip_gen: v6e
topology: v6e:2x2x1
jax: 0.10.0
libtpu: 0.0.40
codegen_flags: <defaults>
</compile_context>

<pallas_src>
import math
import functools

import jax
import jax.numpy as jnp
from jax.experimental import pallas as pl
from jax.experimental.pallas import tpu as pltpu


def mha_kernel(x_ref, wqkv_ref, wo_ref, o_ref, q_scr, k_scr, v_scr,
               *, n_head, d_k, q_tile):
    E = n_head * d_k
    qi = pl.program_id(1)

    # ---- Fused Q/K/V projection, once per batch element (q-tile 0). ----
    @pl.when(qi == 0)
    def _():
        x = x_ref[...]                                            # (T, E)
        qkv = jnp.dot(x, wqkv_ref[...],
                      preferred_element_type=jnp.float32)         # (T, 3E) f32
        qkv = qkv.astype(q_scr.dtype)
        # Re-layout head-major into persistent scratch (static, small loop;
        # runs once per batch element, outside the per-q-tile hot path).
        for h in range(n_head):
            q_scr[h] = qkv[:, h * d_k:(h + 1) * d_k]
            k_scr[h] = qkv[:, E + h * d_k:E + (h + 1) * d_k]
            v_scr[h] = qkv[:, 2 * E + h * d_k:2 * E + (h + 1) * d_k]

    # ---- Attention for this q-tile, all heads batched. ----
    start = pl.multiple_of(qi * q_tile, q_tile)
    q_t = q_scr[:, pl.ds(start, q_tile), :]                       # (H, tq, d_k), scale pre-folded
    k_all = k_scr[...]                                            # (H, T, d_k)
    v_all = v_scr[...]                                            # (H, T, d_k)

    s = jnp.einsum('hqd,hkd->hqk', q_t, k_all,
                   preferred_element_type=jnp.float32)            # (H, tq, T) f32
    s = s - jnp.max(s, axis=-1, keepdims=True)
    p = jnp.exp(s)
    p = p * pl.reciprocal(jnp.sum(p, axis=-1, keepdims=True), approx=True)
    p = p.astype(v_all.dtype)

    ctx = jnp.einsum('hqk,hkd->hqd', p, v_all,
                     preferred_element_type=jnp.float32)          # (H, tq, d_k)
    ctx = ctx.astype(wo_ref.dtype)

    # ---- Output projection: concat-over-heads @ Wo.T
    #      == sum_h ctx[h] @ Wo.T[h*d_k:(h+1)*d_k, :]. ----
    y = jnp.einsum('hqd,hde->hqe', ctx, wo_ref[...],
                   preferred_element_type=jnp.float32)            # (H, tq, E)
    o_ref[...] = jnp.sum(y, axis=0).astype(o_ref.dtype)           # (tq, E)


def mh_attention(x, wq, wk, wv, wo, *, n_head, q_tile=128,
                 compute_dtype=jnp.bfloat16):
    B, T, E = x.shape
    assert E % n_head == 0
    d_k = E // n_head
    cdt = compute_dtype if compute_dtype is not None else x.dtype

    # Pre-transpose (nn.Linear weights are (out, in)), fuse Q/K/V into (E, 3E),
    # and fold the 1/sqrt(d_k) score scale into the Q columns.
    scale = 1.0 / math.sqrt(d_k)
    w_qkv = jnp.concatenate([wq.T * scale, wk.T, wv.T], axis=1)   # (E, 3E)
    # Output projection weight, head-major: rows of wo.T are concat features
    # ordered (h, d), so this reshape is exact.
    w_out = wo.T.reshape(n_head, d_k, E)                          # (H, d_k, E)

    x_c = x.astype(cdt)
    w_qkv = w_qkv.astype(cdt)
    w_out = w_out.astype(cdt)

    tq = min(q_tile, T)
    if T % tq != 0:
        tq = T   # TODO(synk): handle ragged T with a masked last q-tile.
    n_q = T // tq

    # Rough VMEM budget (double-buffered blocks + persistent scratch + f32
    # softmax temporaries), clamped so it stays valid on every chip
    # (v5e/v6e: 128 MiB physical, v7x: 64 MiB physical per TC).
    itemsize = jnp.dtype(cdt).itemsize

    def _pad(n, m):
        return ((n + m - 1) // m) * m

    vmem_est = (
        2 * _pad(T, 8) * _pad(E, 128) * itemsize                    # x block
        + 2 * _pad(E, 8) * _pad(3 * E, 128) * itemsize              # fused QKV weight
        + 2 * n_head * _pad(d_k, 8) * _pad(E, 128) * itemsize       # out-proj weight
        + 2 * _pad(tq, 8) * _pad(E, 128) * x.dtype.itemsize         # output block
        + 3 * n_head * _pad(T, 8) * _pad(d_k, 128) * itemsize       # Q/K/V scratch
        + 3 * n_head * _pad(tq, 8) * _pad(T, 128) * 4               # f32 score temporaries
    )
    vmem_limit = int(min(max(2 * vmem_est, 32 * 1024 * 1024), 64 * 1024 * 1024))

    kernel = functools.partial(mha_kernel, n_head=n_head, d_k=d_k, q_tile=tq)

    return pl.pallas_call(
        kernel,
        out_shape=jax.ShapeDtypeStruct((B, T, E), x.dtype),
        grid_spec=pltpu.PrefetchScalarGridSpec(
            num_scalar_prefetch=0,
            grid=(B, n_q),
            in_specs=[
                # Full sequence for this batch element (index constant over qi
                # => DMA'd once per b). Leading batch dim squeezed.
                pl.BlockSpec((None, T, E), lambda b, qi: (b, 0, 0)),
                pl.BlockSpec((E, 3 * E), lambda b, qi: (0, 0)),
                pl.BlockSpec((n_head, d_k, E), lambda b, qi: (0, 0, 0)),
            ],
            out_specs=pl.BlockSpec((None, tq, E), lambda b, qi: (b, qi, 0)),
            scratch_shapes=[
                pltpu.VMEM((n_head, T, d_k), cdt),   # Q (pre-scaled)
                pltpu.VMEM((n_head, T, d_k), cdt),   # K
                pltpu.VMEM((n_head, T, d_k), cdt),   # V
            ],
        ),
        compiler_params=pltpu.CompilerParams(
            dimension_semantics=("parallel", "arbitrary"),
            vmem_limit_bytes=vmem_limit,
        ),
    )(x_c, w_qkv, w_out)


def mh_attention_ref(x, wq, wk, wv, wo, *, n_head):
    """Pure-JAX reference mirroring the PyTorch forward exactly (f32)."""
    B, T, E = x.shape
    d_k = E // n_head
    q = (x @ wq.T).reshape(B, T, n_head, d_k).transpose(0, 2, 1, 3)
    k = (x @ wk.T).reshape(B, T, n_head, d_k).transpose(0, 2, 1, 3)
    v = (x @ wv.T).reshape(B, T, n_head, d_k).transpose(0, 2, 1, 3)
    scores = (q @ jnp.swapaxes(k, -2, -1)) / math.sqrt(d_k)
    attn = jax.nn.softmax(scores, axis=-1)
    out = attn @ v                                               # (B, H, T, d_k)
    concat = out.transpose(0, 2, 1, 3).reshape(B, T, E)
    return concat @ wo.T


if __name__ == "__main__":
    # Small ModelArgs-consistent shapes: n_embd=32, n_head=4 (d_k=8), seq=8, batch=2.
    B, T, E, H = 2, 8, 32, 4

    key = jax.random.PRNGKey(0)
    kx, kq, kk, kv, ko = jax.random.split(key, 5)

    # Deterministic init mimicking nn.Linear default: U(-1/sqrt(in), 1/sqrt(in)).
    bound = 1.0 / math.sqrt(E)
    x = jax.random.normal(kx, (B, T, E), dtype=jnp.float32)
    wq = jax.random.uniform(kq, (E, E), jnp.float32, -bound, bound)
    wk = jax.random.uniform(kk, (E, E), jnp.float32, -bound, bound)
    wv = jax.random.uniform(kv, (E, E), jnp.float32, -bound, bound)
    wo = jax.random.uniform(ko, (E, E), jnp.float32, -bound, bound)

    ref = mh_attention_ref(x, wq, wk, wv, wo, n_head=H)

    # f32 compute path (approx reciprocal is the only deviation from ref).
    out_f32 = jax.block_until_ready(
        mh_attention(x, wq, wk, wv, wo, n_head=H, compute_dtype=jnp.float32))
    assert out_f32.shape == (B, T, E)
    assert jnp.allclose(out_f32, ref, atol=2e-2, rtol=2e-2), "f32 mismatch vs reference"

    # bf16 MXU path (the recommended perf configuration; looser tolerance).
    out_bf16 = jax.block_until_ready(
        mh_attention(x, wq, wk, wv, wo, n_head=H, compute_dtype=jnp.bfloat16))
    assert out_bf16.shape == (B, T, E)
    assert jnp.allclose(out_bf16, ref, atol=1e-1, rtol=1e-1), "bf16 mismatch vs reference"

    print("KERNEL_OK")
</pallas_src>

<mosaic_0001>
module attributes {stable_mosaic.version = 11 : i64} {
  func.func @mha_kernel(%arg0: i32, %arg1: i32, %arg2: memref<1x8x32xf32, #tpu.memory_space<vmem>>, %arg3: memref<32x96xf32, #tpu.memory_space<vmem>>, %arg4: memref<4x8x32xf32, #tpu.memory_space<vmem>>, %arg5: memref<1x8x32xf32, #tpu.memory_space<vmem>>, %arg6: memref<4x8x8xf32, #tpu.memory_space<vmem>>, %arg7: memref<4x8x8xf32, #tpu.memory_space<vmem>>, %arg8: memref<4x8x8xf32, #tpu.memory_space<vmem>>) attributes {dimension_semantics = [#tpu.dimension_semantics<parallel>, #tpu.dimension_semantics<arbitrary>], iteration_bounds = array<i64: 2, 1>, scalar_prefetch = 0 : i64, scratch_operands = 3 : i64, tpu.core_type = #tpu.core_type<tc>, window_params = [{transform_indices = @transform_0, window_bounds = array<i64: 1, 8, 32>}, {pipeline_mode = #tpu.pipeline_mode<synchronous>, transform_indices = @transform_1, window_bounds = array<i64: 32, 96>}, {pipeline_mode = #tpu.pipeline_mode<synchronous>, transform_indices = @transform_2, window_bounds = array<i64: 4, 8, 32>}, {transform_indices = @transform_3, window_bounds = array<i64: 1, 8, 32>}]} {
    %c0_i32 = arith.constant 0 : i32
    %0 = arith.cmpi eq, %arg1, %c0_i32 : i32
    %1 = arith.extui %0 : i1 to i32
    %c0_i32_0 = arith.constant 0 : i32
    %2 = arith.cmpi ne, %1, %c0_i32_0 : i32
    scf.if %2 {
      %c0_19 = arith.constant 0 : index
      %c0_20 = arith.constant 0 : index
      %c0_21 = arith.constant 0 : index
      %27 = vector.load %arg2[%c0_19, %c0_20, %c0_21] : memref<1x8x32xf32, #tpu.memory_space<vmem>>, vector<1x8x32xf32>
      %28 = vector.shape_cast %27 : vector<1x8x32xf32> to vector<8x32xf32>
      %c0_22 = arith.constant 0 : index
      %c0_23 = arith.constant 0 : index
      %29 = vector.load %arg3[%c0_22, %c0_23] : memref<32x96xf32, #tpu.memory_space<vmem>>, vector<32x96xf32>
      %cst_24 = arith.constant dense<0.000000e+00> : vector<8x96xf32>
      %30 = tpu.matmul %28, %29, %cst_24 {dimension_numbers = #tpu.dot_dimension_numbers<[1], [0], [0], [1], [0, 0, 1, 1], [], []>} : vector<8x32xf32>, vector<32x96xf32>, vector<8x96xf32> -> vector<8x96xf32>
      %31 = vector.extract_strided_slice %30 {offsets = [0, 0], sizes = [8, 8], strides = [1, 1]} : vector<8x96xf32> to vector<8x8xf32>
      %c0_25 = arith.constant 0 : index
      %c0_26 = arith.constant 0 : index
      %c0_27 = arith.constant 0 : index
      %32 = vector.load %arg6[%c0_25, %c0_26, %c0_27] : memref<4x8x8xf32, #tpu.memory_space<vmem>>, vector<1x8x8xf32>
      %33 = vector.shape_cast %32 : vector<1x8x8xf32> to vector<8x8xf32>
      %34 = vector.shape_cast %31 : vector<8x8xf32> to vector<1x8x8xf32>
      tpu.vector_store %arg6[%c0_25, %c0_26, %c0_27], %34 {strides = array<i32>} : memref<4x8x8xf32, #tpu.memory_space<vmem>>, vector<1x8x8xf32>,
      %35 = vector.extract_strided_slice %30 {offsets = [0, 32], sizes = [8, 8], strides = [1, 1]} : vector<8x96xf32> to vector<8x8xf32>
      %c0_28 = arith.constant 0 : index
      %c0_29 = arith.constant 0 : index
      %c0_30 = arith.constant 0 : index
      %36 = vector.load %arg7[%c0_28, %c0_29, %c0_30] : memref<4x8x8xf32, #tpu.memory_space<vmem>>, vector<1x8x8xf32>
      %37 = vector.shape_cast %36 : vector<1x8x8xf32> to vector<8x8xf32>
      %38 = vector.shape_cast %35 : vector<8x8xf32> to vector<1x8x8xf32>
      tpu.vector_store %arg7[%c0_28, %c0_29, %c0_30], %38 {strides = array<i32>} : memref<4x8x8xf32, #tpu.memory_space<vmem>>, vector<1x8x8xf32>,
      %39 = vector.extract_strided_slice %30 {offsets = [0, 64], sizes = [8, 8], strides = [1, 1]} : vector<8x96xf32> to vector<8x8xf32>
      %c0_31 = arith.constant 0 : index
      %c0_32 = arith.constant 0 : index
      %c0_33 = arith.constant 0 : index
      %40 = vector.load %arg8[%c0_31, %c0_32, %c0_33] : memref<4x8x8xf32, #tpu.memory_space<vmem>>, vector<1x8x8xf32>
      %41 = vector.shape_cast %40 : vector<1x8x8xf32> to vector<8x8xf32>
      %42 = vector.shape_cast %39 : vector<8x8xf32> to vector<1x8x8xf32>
      tpu.vector_store %arg8[%c0_31, %c0_32, %c0_33], %42 {strides = array<i32>} : memref<4x8x8xf32, #tpu.memory_space<vmem>>, vector<1x8x8xf32>,
      %43 = vector.extract_strided_slice %30 {offsets = [0, 8], sizes = [8, 8], strides = [1, 1]} : vector<8x96xf32> to vector<8x8xf32>
      %c1 = arith.constant 1 : index
      %c0_34 = arith.constant 0 : index
      %c0_35 = arith.constant 0 : index
      %44 = vector.load %arg6[%c1, %c0_34, %c0_35] : memref<4x8x8xf32, #tpu.memory_space<vmem>>, vector<1x8x8xf32>
      %45 = vector.shape_cast %44 : vector<1x8x8xf32> to vector<8x8xf32>
      %46 = vector.shape_cast %43 : vector<8x8xf32> to vector<1x8x8xf32>
      tpu.vector_store %arg6[%c1, %c0_34, %c0_35], %46 {strides = array<i32>} : memref<4x8x8xf32, #tpu.memory_space<vmem>>, vector<1x8x8xf32>,
      %47 = vector.extract_strided_slice %30 {offsets = [0, 40], sizes = [8, 8], strides = [1, 1]} : vector<8x96xf32> to vector<8x8xf32>
      %c1_36 = arith.constant 1 : index
      %c0_37 = arith.constant 0 : index
      %c0_38 = arith.constant 0 : index
      %48 = vector.load %arg7[%c1_36, %c0_37, %c0_38] : memref<4x8x8xf32, #tpu.memory_space<vmem>>, vector<1x8x8xf32>
      %49 = vector.shape_cast %48 : vector<1x8x8xf32> to vector<8x8xf32>
      %50 = vector.shape_cast %47 : vector<8x8xf32> to vector<1x8x8xf32>
      tpu.vector_store %arg7[%c1_36, %c0_37, %c0_38], %50 {strides = array<i32>} : memref<4x8x8xf32, #tpu.memory_space<vmem>>, vector<1x8x8xf32>,
      %51 = vector.extract_strided_slice %30 {offsets = [0, 72], sizes = [8, 8], strides = [1, 1]} : vector<8x96xf32> to vector<8x8xf32>
      %c1_39 = arith.constant 1 : index
      %c0_40 = arith.constant 0 : index
      %c0_41 = arith.constant 0 : index
      %52 = vector.load %arg8[%c1_39, %c0_40, %c0_41] : memref<4x8x8xf32, #tpu.memory_space<vmem>>, vector<1x8x8xf32>
      %53 = vector.shape_cast %52 : vector<1x8x8xf32> to vector<8x8xf32>
      %54 = vector.shape_cast %51 : vector<8x8xf32> to vector<1x8x8xf32>
      tpu.vector_store %arg8[%c1_39, %c0_40, %c0_41], %54 {strides = array<i32>} : memref<4x8x8xf32, #tpu.memory_space<vmem>>, vector<1x8x8xf32>,
      %55 = vector.extract_strided_slice %30 {offsets = [0, 16], sizes = [8, 8], strides = [1, 1]} : vector<8x96xf32> to vector<8x8xf32>
      %c2 = arith.constant 2 : index
      %c0_42 = arith.constant 0 : index
      %c0_43 = arith.constant 0 : index
      %56 = vector.load %arg6[%c2, %c0_42, %c0_43] : memref<4x8x8xf32, #tpu.memory_space<vmem>>, vector<1x8x8xf32>
      %57 = vector.shape_cast %56 : vector<1x8x8xf32> to vector<8x8xf32>
      %58 = vector.shape_cast %55 : vector<8x8xf32> to vector<1x8x8xf32>
      tpu.vector_store %arg6[%c2, %c0_42, %c0_43], %58 {strides = array<i32>} : memref<4x8x8xf32, #tpu.memory_space<vmem>>, vector<1x8x8xf32>,
      %59 = vector.extract_strided_slice %30 {offsets = [0, 48], sizes = [8, 8], strides = [1, 1]} : vector<8x96xf32> to vector<8x8xf32>
      %c2_44 = arith.constant 2 : index
      %c0_45 = arith.constant 0 : index
      %c0_46 = arith.constant 0 : index
      %60 = vector.load %arg7[%c2_44, %c0_45, %c0_46] : memref<4x8x8xf32, #tpu.memory_space<vmem>>, vector<1x8x8xf32>
      %61 = vector.shape_cast %60 : vector<1x8x8xf32> to vector<8x8xf32>
      %62 = vector.shape_cast %59 : vector<8x8xf32> to vector<1x8x8xf32>
      tpu.vector_store %arg7[%c2_44, %c0_45, %c0_46], %62 {strides = array<i32>} : memref<4x8x8xf32, #tpu.memory_space<vmem>>, vector<1x8x8xf32>,
      %63 = vector.extract_strided_slice %30 {offsets = [0, 80], sizes = [8, 8], strides = [1, 1]} : vector<8x96xf32> to vector<8x8xf32>
      %c2_47 = arith.constant 2 : index
      %c0_48 = arith.constant 0 : index
      %c0_49 = arith.constant 0 : index
      %64 = vector.load %arg8[%c2_47, %c0_48, %c0_49] : memref<4x8x8xf32, #tpu.memory_space<vmem>>, vector<1x8x8xf32>
      %65 = vector.shape_cast %64 : vector<1x8x8xf32> to vector<8x8xf32>
      %66 = vector.shape_cast %63 : vector<8x8xf32> to vector<1x8x8xf32>
      tpu.vector_store %arg8[%c2_47, %c0_48, %c0_49], %66 {strides = array<i32>} : memref<4x8x8xf32, #tpu.memory_space<vmem>>, vector<1x8x8xf32>,
      %67 = vector.extract_strided_slice %30 {offsets = [0, 24], sizes = [8, 8], strides = [1, 1]} : vector<8x96xf32> to vector<8x8xf32>
      %c3 = arith.constant 3 : index
      %c0_50 = arith.constant 0 : index
      %c0_51 = arith.constant 0 : index
      %68 = vector.load %arg6[%c3, %c0_50, %c0_51] : memref<4x8x8xf32, #tpu.memory_space<vmem>>, vector<1x8x8xf32>
      %69 = vector.shape_cast %68 : vector<1x8x8xf32> to vector<8x8xf32>
      %70 = vector.shape_cast %67 : vector<8x8xf32> to vector<1x8x8xf32>
      tpu.vector_store %arg6[%c3, %c0_50, %c0_51], %70 {strides = array<i32>} : memref<4x8x8xf32, #tpu.memory_space<vmem>>, vector<1x8x8xf32>,
      %71 = vector.extract_strided_slice %30 {offsets = [0, 56], sizes = [8, 8], strides = [1, 1]} : vector<8x96xf32> to vector<8x8xf32>
      %c3_52 = arith.constant 3 : index
      %c0_53 = arith.constant 0 : index
      %c0_54 = arith.constant 0 : index
      %72 = vector.load %arg7[%c3_52, %c0_53, %c0_54] : memref<4x8x8xf32, #tpu.memory_space<vmem>>, vector<1x8x8xf32>
      %73 = vector.shape_cast %72 : vector<1x8x8xf32> to vector<8x8xf32>
      %74 = vector.shape_cast %71 : vector<8x8xf32> to vector<1x8x8xf32>
      tpu.vector_store %arg7[%c3_52, %c0_53, %c0_54], %74 {strides = array<i32>} : memref<4x8x8xf32, #tpu.memory_space<vmem>>, vector<1x8x8xf32>,
      %75 = vector.extract_strided_slice %30 {offsets = [0, 88], sizes = [8, 8], strides = [1, 1]} : vector<8x96xf32> to vector<8x8xf32>
      %c3_55 = arith.constant 3 : index
      %c0_56 = arith.constant 0 : index
      %c0_57 = arith.constant 0 : index
      %76 = vector.load %arg8[%c3_55, %c0_56, %c0_57] : memref<4x8x8xf32, #tpu.memory_space<vmem>>, vector<1x8x8xf32>
      %77 = vector.shape_cast %76 : vector<1x8x8xf32> to vector<8x8xf32>
      %78 = vector.shape_cast %75 : vector<8x8xf32> to vector<1x8x8xf32>
      tpu.vector_store %arg8[%c3_55, %c0_56, %c0_57], %78 {strides = array<i32>} : memref<4x8x8xf32, #tpu.memory_space<vmem>>, vector<1x8x8xf32>,
    } else {
    }
    %c8_i32 = arith.constant 8 : i32
    %3 = arith.muli %arg1, %c8_i32 : i32
    %4 = tpu.assume_multiple %3, 8 : i32
    %c0 = arith.constant 0 : index
    %5 = arith.index_cast %4 : i32 to index
    %c0_1 = arith.constant 0 : index
    %6 = vector.load %arg6[%c0, %5, %c0_1] : memref<4x8x8xf32, #tpu.memory_space<vmem>>, vector<4x8x8xf32>
    %c0_2 = arith.constant 0 : index
    %c0_3 = arith.constant 0 : index
    %c0_4 = arith.constant 0 : index
    %7 = vector.load %arg7[%c0_2, %c0_3, %c0_4] : memref<4x8x8xf32, #tpu.memory_space<vmem>>, vector<4x8x8xf32>
    %c0_5 = arith.constant 0 : index
    %c0_6 = arith.constant 0 : index
    %c0_7 = arith.constant 0 : index
    %8 = vector.load %arg8[%c0_5, %c0_6, %c0_7] : memref<4x8x8xf32, #tpu.memory_space<vmem>>, vector<4x8x8xf32>
    "tpu.trace_start"() <{level = 10 : i32, message = "hqd,hkd->hqk"}> : () -> ()
    %cst = arith.constant dense<0.000000e+00> : vector<4x8x8xf32>
    %9 = tpu.matmul %6, %7, %cst {dimension_numbers = #tpu.dot_dimension_numbers<[2], [2], [1], [1], [0, 0, 0, 1, 1, 1], [0], [0]>} : vector<4x8x8xf32>, vector<4x8x8xf32>, vector<4x8x8xf32> -> vector<4x8x8xf32>
    "tpu.trace_stop"() : () -> ()
    %cst_8 = arith.constant dense<0xFF800000> : vector<4x8xf32>
    %10 = vector.multi_reduction <maximumf>, %9, %cst_8 [2] : vector<4x8x8xf32> to vector<4x8xf32>
    %11 = vector.shape_cast %10 : vector<4x8xf32> to vector<4x8x1xf32>
    %12 = vector.broadcast %11 : vector<4x8x1xf32> to vector<4x8x8xf32>
    %13 = arith.subf %9, %12 : vector<4x8x8xf32>
    %14 = math.exp %13 : vector<4x8x8xf32>
    %cst_9 = arith.constant dense<0.000000e+00> : vector<4x8xf32>
    %15 = vector.multi_reduction <add>, %14, %cst_9 [2] : vector<4x8x8xf32> to vector<4x8xf32>
    %16 = vector.shape_cast %15 : vector<4x8xf32> to vector<4x8x1xf32>
    %17 = tpu.reciprocal %16 {approx = true} : vector<4x8x1xf32> -> vector<4x8x1xf32>
    %18 = vector.broadcast %17 : vector<4x8x1xf32> to vector<4x8x8xf32>
    %19 = arith.mulf %14, %18 : vector<4x8x8xf32>
    "tpu.trace_start"() <{level = 10 : i32, message = "hqk,hkd->hqd"}> : () -> ()
    %cst_10 = arith.constant dense<0.000000e+00> : vector<4x8x8xf32>
    %20 = tpu.matmul %19, %8, %cst_10 {dimension_numbers = #tpu.dot_dimension_numbers<[2], [1], [1], [2], [0, 0, 0, 1, 1, 2], [0], [0]>} : vector<4x8x8xf32>, vector<4x8x8xf32>, vector<4x8x8xf32> -> vector<4x8x8xf32>
    "tpu.trace_stop"() : () -> ()
    %c0_11 = arith.constant 0 : index
    %c0_12 = arith.constant 0 : index
    %c0_13 = arith.constant 0 : index
    %21 = vector.load %arg4[%c0_11, %c0_12, %c0_13] : memref<4x8x32xf32, #tpu.memory_space<vmem>>, vector<4x8x32xf32>
    "tpu.trace_start"() <{level = 10 : i32, message = "hqd,hde->hqe"}> : () -> ()
    %cst_14 = arith.constant dense<0.000000e+00> : vector<4x8x32xf32>
    %22 = tpu.matmul %20, %21, %cst_14 {dimension_numbers = #tpu.dot_dimension_numbers<[2], [1], [1], [2], [0, 0, 0, 1, 1, 2], [0], [0]>} : vector<4x8x8xf32>, vector<4x8x32xf32>, vector<4x8x32xf32> -> vector<4x8x32xf32>
    "tpu.trace_stop"() : () -> ()
    %cst_15 = arith.constant dense<0.000000e+00> : vector<8x32xf32>
    %23 = vector.multi_reduction <add>, %22, %cst_15 [0] : vector<4x8x32xf32> to vector<8x32xf32>
    %c0_16 = arith.constant 0 : index
    %c0_17 = arith.constant 0 : index
    %c0_18 = arith.constant 0 : index
    %24 = vector.load %arg5[%c0_16, %c0_17, %c0_18] : memref<1x8x32xf32, #tpu.memory_space<vmem>>, vector<1x8x32xf32>
    %25 = vector.shape_cast %24 : vector<1x8x32xf32> to vector<8x32xf32>
    %26 = vector.shape_cast %23 : vector<8x32xf32> to vector<1x8x32xf32>
    tpu.vector_store %arg5[%c0_16, %c0_17, %c0_18], %26 {strides = array<i32>} : memref<1x8x32xf32, #tpu.memory_space<vmem>>, vector<1x8x32xf32>,
    return
  }
  func.func @transform_0(%arg0: i32, %arg1: i32) -> (i32, i32, i32) {
    %c0_i32 = arith.constant 0 : i32
    %c0_i32_0 = arith.constant 0 : i32
    %c0_i32_1 = arith.constant 0 : i32
    return %arg0, %c0_i32, %c0_i32_0 : i32, i32, i32
  }
  func.func @transform_1(%arg0: i32, %arg1: i32) -> (i32, i32) {
    %c0_i32 = arith.constant 0 : i32
    %c0_i32_0 = arith.constant 0 : i32
    %c0_i32_1 = arith.constant 0 : i32
    return %c0_i32, %c0_i32_0 : i32, i32
  }
  func.func @transform_2(%arg0: i32, %arg1: i32) -> (i32, i32, i32) {
    %c0_i32 = arith.constant 0 : i32
    %c0_i32_0 = arith.constant 0 : i32
    %c0_i32_1 = arith.constant 0 : i32
    %c0_i32_2 = arith.constant 0 : i32
    return %c0_i32, %c0_i32_0, %c0_i32_1 : i32, i32, i32
  }
  func.func @transform_3(%arg0: i32, %arg1: i32) -> (i32, i32, i32) {
    %c0_i32 = arith.constant 0 : i32
    %c0_i32_0 = arith.constant 0 : i32
    return %arg0, %arg1, %c0_i32 : i32, i32, i32
  }
}

</mosaic_0001>

<bundles_post_ra>
// kernel: tpu_custom_call.1
= control target key start
LH: loop header
LB: loop body
LE: loop exit
PB: predicated region body
PF: predicated region fallthrough
CT: control target
= control target key end

     0   :  { %8 = vsyncpa [#allocation6], 0  ;;  %s2172_s0 = inlined_call_operand.hbm [shape: f32[2,8,32], index: 0, kind: input, shape index: {}]   ;;  %s2173_s1 = inlined_call_operand.hbm [shape: f32[32,96], index: 1, kind: input, shape index: {}]   ;;  %s2174_s2 = inlined_call_operand.hbm [shape: f32[4,8,32], index: 2, kind: input, shape index: {}]   ;;  %s2175_s3 = inlined_call_operand.hbm [shape: f32[2,8,32], index: 3, kind: output, shape index: {}]  }
   0x1   :  { %10 = vsyncpa [#allocation6 + $0x1], 0 }
   0x2   :  { %11 = vsyncpa [#allocation9], 0 }
   0x3   :  { %12 = vsyncpa [#allocation7], 0 }
   0x4   :  { %14 = vsyncpa [#allocation7 + $0x1], 0  ;;  %s1896_s12 = smov 0   ;;  %s1898_s13 = smov 0  }
   0x5   :  { %s1900_s14 = smov 0   ;;  %s1902_s15 = smov 0  }
   0x6   :  { %s1904_s16 = smov 0   ;;  %s1906_s17 = smov 0  }
   0x7 LB: > { %s1443_s18 = sadd.s32 4294967295, %s1855_s17   ;;  %s1444_s19 = sadd.s32 4294967294, %s1855_s17   ;;  %s1855_s17 = sphi %s1906_s17, %s20_s17   ;;  %s1851_s16 = sphi %s1904_s16, %s2195_s16   ;;  %s1847_s15 = sphi %s1902_s15, %s2194_s15   ;;  %s1843_s14 = sphi %s1900_s14, %s2193_s14   ;;  %s1839_s13 = sphi %s1898_s13, %s2192_s13   ;;  %s1835_s12 = sphi %s1896_s12, %s2191_s12  }
   0x8   : > { %p52_p0 = scmp.ne.s32.totalorder %s1839_s13, %s1835_s12  ;;  %p1930_p1 = scmp.eq.s32.totalorder %s1443_s18, 0 }
   0x9   : > { %p1934_p2 = scmp.eq.s32.totalorder %s1443_s18, 1  ;;  %p126_p3 = scmp.eq.s32.totalorder %s1444_s19, 1 }
   0xa   : > { %s2179_s20 = scalar_select %p1930_p1, 1, 0 }
   0xb   : > { %p1940_p4 = por %p1930_p1, %p52_p0  ;;  %p1445_p5 = scmp.ge.s32.totalorder %s1855_s17, 1 }
   0xc   : > { %p1945_p6 = por %p126_p3, %p52_p0  ;;  %p133_p7 = scmp.lt.s32.totalorder %s1855_s17, 3 }
   0xd   : > { %s2181_s22 = scalar_select %p1940_p4, 1, 0 }
   0xe   : > { %s2182_s23 = scalar_select %p1945_p6, 1, 0 }
   0xf   : > { %p1950_p8 = pnand %p1445_p5, %p133_p7  ;;  %s1857_s25 = smov [#allocation8]  }
  0x10   : > { %s145_s26 = sshll.u32 %s1857_s25, 4  ;;  %s1858_s28 = smov [#allocation10]   ;;  %s146_s26 = int_to_ptr.vmem [resolvable:$true] %s145_s26 }
  0x11   : > { %p1589_p9 = pneg %p1950_p8  ;;  %s158_s29 = sshll.u32 %s1858_s28, 4  ;;  %s159_s29 = int_to_ptr.vmem [resolvable:$true] %s158_s29 }
  0x12   : > { %s1702_s30 = scalar_lea.vmem %s146_s26, 512  ;;  %p1710_p5 = scmp.lt.s32.totalorder %s146_s26, %s146_s26 }
  0x13   : > { %p1959_p11 = pnand %p1589_p9, %p1930_p1  ;;  %p1703_p13 = scmp.ne.s32.totalorder %s146_s26, %s1702_s30 }
  0x14   : > { %p1711_p7 = scmp.lt.s32.totalorder %s1702_s30, %s1702_s30 }
  0x15   : > { %p1693_p12 = pneg %p1959_p11 }
  0x16   : > { %p1712_p10 = por %p1711_p7, %p1710_p5 }
  0x17   : > { %p1705_p0 = pnand %p1703_p13, %p1693_p12 }
  0x19   : > { %p1706_p3 = pneg %p1705_p0 }
  0x1b   : > { %p1713_p9 = pnand %p1712_p10, %p1706_p3 }
  0x1d   : > { %1716 = shalt.err (!%p1713_p9)
}
  0x1e   : > { %s1859_s4 = smov 128   ;;  %s1860_s5 = smov 8  }
  0x1f   : > { %1592 = dma.hbm_to_vmem [thread:$0]  (!%p1959_p11), %s2173_s1, 512, %s146_s26, [#allocation9], %s1859_s4, %s1859_s4, %s1860_s5  }
  0x20   : > { %s1728_s8 = scalar_lea.vmem %s159_s29, 512  ;;  %p1736_p1 = scmp.lt.s32.totalorder %s159_s29, %s159_s29 }
  0x21   : > { %p1729_p6 = scmp.ne.s32.totalorder %s159_s29, %s1728_s8  ;;  %p1737_p4 = scmp.lt.s32.totalorder %s1728_s8, %s1728_s8 }
  0x23   : > { %p1731_p13 = pnand %p1729_p6, %p1693_p12  ;;  %p1738_p5 = por %p1737_p4, %p1736_p1 }
  0x25   : > { %p1732_p0 = pneg %p1731_p13 }
  0x27   : > { %p1739_p10 = pnand %p1738_p5, %p1732_p0 }
  0x29   : > { %1742 = shalt.err (!%p1739_p10)
}
  0x2a   : > { %1595 = dma.hbm_to_vmem [thread:$0]  (!%p1959_p11), %s2174_s2, 512, %s159_s29, [#allocation9], %s1859_s4, %s1859_s4, %s1860_s5  }
  0x2b   : > { %s32_s11 = sadd.s32 1, %s1851_s16  ;;  %s39_s18 = sadd.s32 1, %s1843_s14 }
  0x2c   : > { %p34_p1 = scmp.ge.s32.totalorder %s32_s11, 2  ;;  %p46_p4 = scmp.ne.s32.totalorder %s1843_s14, %s1839_s13 }
  0x2d   : > { %p47_p6 = scmp.eq.s32.totalorder %s1855_s17, 0  ;;  %p1606_p12 = scmp.lt.s32.totalorder %s1855_s17, 2 }
  0x2e   : > { %s2197_s11 = smov (%p34_p1, %s32_s11), 0  ;;  %p1991_p7 = por %p1934_p2, %p46_p4 }
  0x2f   : > { %p48_p3 = por %p47_p6, %p46_p4  ;;  %s36_s25 = ssub.s32 %s1851_s16, %s2197_s11 }
  0x30   : > { %s172_s26 = sand.u32 1, %s1843_s14   ;;  %p37_p9 = scmp.eq.s32.totalorder %s36_s25, 0 }
  0x31   : > { %s1449_s27 = sshll.u32 %s172_s26, 3  ;;  %s1450_s28 = sshll.u32 %s1851_s16, 7 }
  0x32   : > { %s2000_s29 = scalar_select %p37_p9, %s1843_s14, %s39_s18  }
  0x33   : > { %s181_s5 = scalar_lea.hbm %s2172_s0, %s1450_s28  ;;  %s176_s6 = scalar_lea.vmem [#allocation5], %s1449_s27 }
  0x34   : > { %s183_s7 = sshll.u32 %s176_s6, 4  ;;  %p2007_p11 = pnand %p1606_p12, %p48_p3  ;;  %s184_s7 = int_to_ptr.vmem [resolvable:$true] %s183_s7 }
  0x35   : > { %s173_s8 = scalar_lea.sflag [#allocation6], %s172_s26  ;;  %s1756_s9 = scalar_lea.vmem %s184_s7, 128 }
  0x36   : > { %p1745_p2 = pneg %p2007_p11  ;;  %p1757_p13 = scmp.ne.s32.totalorder %s184_s7, %s1756_s9 }
  0x37   : > { %s1861_s10 = smov [#allocation5]  }
  0x38   : > { %p1759_p0 = pnand %p1757_p13, %p1745_p2  ;;  %s1761_s18 = sshll.u32 %s1861_s10, 4  ;;  %s1762_s18 = int_to_ptr.vmem [resolvable:$false] %s1761_s18 }
  0x39   : > { %s1763_s25 = scalar_lea.vmem %s1762_s18, 256  ;;  %p1764_p10 = scmp.lt.s32.totalorder %s184_s7, %s1762_s18 }
  0x3a   : > { %p1760_p5 = pneg %p1759_p0  ;;  %p1765_p1 = scmp.lt.s32.totalorder %s1763_s25, %s1756_s9 }
  0x3c   : > { %p1766_p4 = por %p1765_p1, %p1764_p10 }
  0x3e   : > { %p1767_p6 = pnand %p1766_p4, %p1760_p5 }
  0x40   : > { %1770 = shalt.err (!%p1767_p6)
}
  0x41   : > { %1599 = dma.hbm_to_vmem [thread:$0]  (!%p2007_p11), %s181_s5, 128, %s184_s7, %s173_s8  }
  0x42   : > { %192 = sbr.rel (%p1950_p8) target bundleno = 1321 (0x529), region = 32  ;;  %s2018_s26 = sand.u32 (!%p1950_p8), 1, %s1839_s13  }
  0x43   : > { %s1452_s27 = sshll.u32 (!%p1950_p8), %s2018_s26, 3  ;;  %s195_s28 = scalar_lea.sflag (!%p1950_p8), [#allocation6], %s2018_s26 }
  0x44   : > { %s198_s30 = scalar_lea.vmem (!%p1950_p8), [#allocation5], %s1452_s27  ;;  %p2187_p12 = scmp.ne.s32.totalorder (!%p1950_p8), %s2181_s22, 0 }
  0x47   : > { %1822 = dma.done.wait (%p2187_p12), %s195_s28, 128  }
  0x48   : > { %1824 = vsyncadd (%p2187_p12), %s195_s28, 4294967168  ;;  %p2188_p3 = scmp.ne.s32.totalorder %s2179_s20, 0 }
  0x4a   : > { %1826 = dma.done.wait (%p2188_p3), [#allocation9], 1024  }
  0x4b   : > { %1828 = vsyncadd (%p2188_p3), [#allocation9], 4294966272  ;;  %v1862_v0 = vmov 0.0   ;;  %vm1863_vm0 = vmmov 0   ;;  %v237_v1 = vld [vmem:[#allocation8 + $0x18] sm:$0xff]  ;;  %v236_v2 = vld [vmem:[#allocation8 + $0x10] sm:$0xff] }
  0x4c   : > { %1506 = vmatprep.subr.mxu0 %v1862_v0  ;;  %1514 = vmatprep.mubr.msk.f32.mxu0 %vm1863_vm0, %v1862_v0  ;;  %v235_v3 = vld [vmem:[#allocation8 + $0x8] sm:$0xff]  ;;  %v234_v4 = vld [vmem:[#allocation8] sm:$0xff]  ;;  %v233_v5 = vld [vmem:[%s198_s30] sm:$0xff]  ;;  %vm238_vm1 = vcmask 261120   ;;  %vm312_vm2 = vcmask 64512   ;;  %s1864_s20 = smov 80  }
  0x4d   : > { %1517 = vmatprep.subr.mxu1 %v1862_v0  ;;  %1519 = vmatprep.mubr.msk.f32.mxu1 %vm1863_vm0, %v1862_v0  ;;  %s1865_s22 = smov 96   ;;  %s1866_s24 = smov 120  }
  0x4e   : > { %1507 = vmatpush3.msra.mxu0 %v237_v1  ;;  %s1867_s4 = smov 88   ;;  %s1868_s5 = smov 112  }
  0x4f   : > { %1508 = vmatprep.subr.mxu0 %v1862_v0  ;;  %s1869_s6 = smov 72   ;;  %s1870_s7 = smov 104  }
  0x50   : > { %1509 = vmatpush3.msra.mxu0 %v236_v2  ;;  %s1871_s21 = smov 56   ;;  %s1872_s8 = smov 64  }
  0x51   : > { %1510 = vmatprep.subr.mxu0 %v1862_v0  ;;  %s1873_s9 = smov 48   ;;  %s1874_s10 = smov 40  }
  0x52   : > { %1511 = vmatpush3.msra.mxu0 %v235_v3  ;;  %s1474_s18 = sshll.u32 %s1847_s15, 7  ;;  %s228_s25 = scalar_lea.vmem [#allocation11], %s1452_s27 }
  0x53   : > { %1512 = vmatprep.subr.mxu0 %v1862_v0  ;;  %s1343_s28 = sshll.u32 %s228_s25, 4  ;;  %s1875_s15 = smov [#allocation11]   ;;  %s1344_s28 = int_to_ptr.vmem [resolvable:$true] %s1343_s28 }
  0x54   : > { %1513 = vmatpush3.msra.mxu0 %v234_v4  ;;  %s1775_s27 = sshll.u32 %s1875_s15, 4  ;;  %s1776_s27 = int_to_ptr.vmem [resolvable:$false] %s1775_s27 }
  0x55   : > { %1515 = vmatmul.mubr.msk.f32.vlgmr.msra.gmra.mxu0 %vm238_vm1, %v233_v5  ;;  %1527 = vmatprep.subr.mxu0 %v1862_v0  ;;  %p1778_p2 = scmp.lt.s32.totalorder %s1344_s28, %s1776_s27 }
  0x56   : > { %1529 = vmatprep.mubr.msk.f32.mxu0 %vm1863_vm0, %v1862_v0 }
 0x115   : > { %v2045_v6 = vpop.f32.mrf.mxu0 }
 0x116   : > { %343 = vrot.lane.b32.xlu1 %v2045_v6, %s1864_s20  ;;  %315 = vrot.lane.b32.xlu0 %v2045_v6, %s1865_s22  ;;  %313 = vst.msk [vmem:[#allocation2] sm:$0xff] %vm312_vm2, %v2045_v6  ;;  %s1341_s22 = scalar_lea.hbm %s2175_s3, %s1474_s18 }
 0x117   : > { %v1516_v7 = vpop.f32.mrf.mxu0 }
 0x11a   : > { %323 = vrot.lane.b32.xlu1 %v2045_v6, %s1866_s24  ;;  %328 = vrot.lane.b32.xlu0 %v2045_v6, %s1867_s4  ;;  %s1329_s24 = scalar_lea.sflag [#allocation7], %s2018_s26  ;;  %s1771_s4 = scalar_lea.vmem %s1344_s28, 128 }
 0x11b   : > { %p1772_p8 = scmp.ne.s32.totalorder %s1344_s28, %s1771_s4 }
 0x11d   : > { %v370_v16 = vld [vmem:[#allocation2] sm:$0xff]  ;;  %p1773_p9 = pnand %p1772_p8, %p1991_p7 }
 0x11e   : > { %338 = vrot.lane.b32.xlu1 %v2045_v6, %s1868_s5  ;;  %358 = vrot.lane.b32.xlu0 %v2045_v6, %s1869_s6  ;;  %s1777_s5 = scalar_lea.vmem %s1776_s27, 256 }
 0x11f   : > { %p1774_p11 = pneg %p1773_p9  ;;  %p1779_p13 = scmp.lt.s32.totalorder %s1777_s5, %s1771_s4 }
 0x121   : > { %p1780_p0 = por %p1779_p13, %p1778_p2 }
 0x122   : > { %353 = vrot.lane.b32.xlu0 %v2045_v6, %s1870_s7 }
 0x123   : > { %p1781_p5 = pnand %p1780_p0, %p1774_p11 }
 0x188   : > { %v344_v8 = vpop.permute.xlu1 %343  ;;  %v316_v9 = vpop.permute.xlu0 %315 }
 0x189   : > { %347 = vst.msk [vmem:[#allocation3 + $0x10] sm:$0xff] %vm312_vm2, %v344_v8  ;;  %318 = vst.msk [vmem:[#allocation3] sm:$0xff] %vm312_vm2, %v316_v9 }
 0x18c   : > { %v324_v10 = vpop.permute.xlu1 %323  ;;  %v329_v11 = vpop.permute.xlu0 %328 }
 0x18d   : > { %327 = vst.msk [vmem:[#allocation2 + $0x8] sm:$0xff] %vm312_vm2, %v324_v10  ;;  %332 = vst.msk [vmem:[#allocation3 + $0x8] sm:$0xff] %vm312_vm2, %v329_v11 }
 0x190   : > { %v339_v12 = vpop.permute.xlu1 %338  ;;  %v359_v13 = vpop.permute.xlu0 %358  ;;  %v374_v14 = vld [vmem:[#allocation3] sm:$0xff]  ;;  %v376_v15 = vld [vmem:[#allocation3 + $0x10] sm:$0xff] }
 0x191   : > { %342 = vst.msk [vmem:[#allocation2 + $0x10] sm:$0xff] %vm312_vm2, %v339_v12  ;;  %362 = vst.msk [vmem:[#allocation3 + $0x18] sm:$0xff] %vm312_vm2, %v359_v13  ;;  %1518 = vmatpush3.xpose.msk.msra.mxu1 %vm312_vm2, %v374_v14  ;;  %1528 = vmatpush3.xpose.msk.msra.mxu0 %vm312_vm2, %v376_v15  ;;  %v1023_v12 = vld [vmem:[#allocation10] sm:$0xff]  ;;  %v1024_v13 = vld [vmem:[#allocation10 + $0x8] sm:$0xff] }
 0x192   : > { %1522 = vmatprep.subr.mxu1 %v1862_v0  ;;  %1537 = vmatprep.subr.mxu0 %v1862_v0  ;;  %v1025_v14 = vld [vmem:[#allocation10 + $0x10] sm:$0xff] }
 0x194   : > { %v354_v17 = vpop.permute.xlu0 %353  ;;  %1520 = vmatmul.mubr.msk.f32.vlgmr.msra.gmra.mxu1 %vm312_vm2, %v370_v16  ;;  %v375_v18 = vld [vmem:[#allocation3 + $0x8] sm:$0xff] }
 0x195   : > { %357 = vst.msk [vmem:[#allocation2 + $0x18] sm:$0xff] %vm312_vm2, %v354_v17  ;;  %1523 = vmatpush3.xpose.msk.msra.mxu1 %vm312_vm2, %v375_v18  ;;  %1524 = vmatprep.mubr.msk.f32.mxu1 %vm1863_vm0, %v1862_v0  ;;  %v371_v19 = vld [vmem:[#allocation2 + $0x8] sm:$0xff] }
 0x196   : > { %1532 = vmatprep.subr.mxu1 %v1862_v0  ;;  %v1026_v17 = vld [vmem:[#allocation10 + $0x18] sm:$0xff] }
 0x198   : > { %1525 = vmatmul.mubr.msk.f32.vlgmr.msra.gmra.mxu1 %vm312_vm2, %v371_v19  ;;  %v372_v20 = vld [vmem:[#allocation2 + $0x10] sm:$0xff]  ;;  %v377_v21 = vld [vmem:[#allocation3 + $0x18] sm:$0xff] }
 0x199   : > { %1530 = vmatmul.mubr.msk.f32.vlgmr.msra.gmra.mxu0 %vm312_vm2, %v372_v20  ;;  %1533 = vmatpush3.xpose.msk.msra.mxu1 %vm312_vm2, %v377_v21 }
 0x19a   : > { %1534 = vmatprep.mubr.msk.f32.mxu1 %vm1863_vm0, %v1862_v0  ;;  %1542 = vmatprep.subr.mxu1 %v1862_v0 }
 0x19b   : > { %1539 = vmatprep.mubr.msk.f32.mxu0 %vm1863_vm0, %v1862_v0 }
 0x19c   : > { %v373_v22 = vld [vmem:[#allocation2 + $0x18] sm:$0xff] }
 0x19d   : > { %1535 = vmatmul.mubr.msk.f32.vlgmr.msra.gmra.mxu1 %vm312_vm2, %v373_v22 }
 0x19e   : > { %1544 = vmatprep.mubr.msk.f32.mxu1 %vm1863_vm0, %v1862_v0 }
 0x254   : > { %v455_v23 = vpop.f32.mrf.mxu1 }
 0x255   : > { %v687_v24 = vsel %vm312_vm2, %v455_v23, -inf }
 0x256   : > { %688 = vmax.xlane.f32.xlu1 %v687_v24  ;;  %v1521_v25 = vpop.f32.mrf.mxu1 }
 0x258   : > { %v531_v26 = vpop.f32.mrf.mxu1 }
 0x259   : > { %v607_v27 = vpop.f32.mrf.mxu0  ;;  %v690_v28 = vsel %vm312_vm2, %v531_v26, -inf }
 0x25a   : > { %691 = vmax.xlane.f32.xlu0 %v690_v28  ;;  %v1526_v29 = vpop.f32.mrf.mxu1  ;;  %v693_v32 = vsel %vm312_vm2, %v607_v27, -inf }
 0x25b   : > { %v1531_v30 = vpop.f32.mrf.mxu0 }
 0x25d   : > { %v683_v31 = vpop.f32.mrf.mxu1 }
 0x25e   : > { %694 = vmax.xlane.f32.xlu0 %v693_v32  ;;  %v696_v33 = vsel %vm312_vm2, %v683_v31, -inf }
 0x25f   : > { %697 = vmax.xlane.f32.xlu1 %v696_v33  ;;  %v1536_v34 = vpop.f32.mrf.mxu1 }
 0x270   : > { %333 = vrot.lane.b32.xlu1 %v2045_v6, %s1871_s21 }
 0x274   : > { %319 = vrot.lane.b32.xlu0 %v2045_v6, %s1872_s8 }
 0x2df   : > { %v689_v35 = vpop.xlane.xlu1 %688 }
 0x2e0   : > { %v699_v36 = vsub.f32 %v455_v23, %v689_v35 }
 0x2e2   : > { %v703_v37 = vmul.f32 1.442695, %v699_v36 }
 0x2e3   : > { %v692_v38 = vpop.xlane.xlu0 %691 }
 0x2e4   : > { %1675 = vpow2.f32 %v703_v37  ;;  %v700_v39 = vsub.f32 %v531_v26, %v692_v38 }
 0x2e6   : > { %v705_v40 = vmul.f32 1.442695, %v700_v39 }
 0x2e7   : > { %v695_v41 = vpop.xlane.xlu0 %694 }
 0x2e8   : > { %1677 = vpow2.f32 %v705_v40  ;;  %v701_v42 = vsub.f32 %v607_v27, %v695_v41  ;;  %v698_v43 = vpop.xlane.xlu1 %697 }
 0x2e9   : > { %v702_v44 = vsub.f32 %v683_v31, %v698_v43 }
 0x2ea   : > { %v707_v45 = vmul.f32 1.442695, %v701_v42 }
 0x2eb   : > { %v709_v46 = vmul.f32 1.442695, %v702_v44  ;;  %v320_v47 = vpop.permute.xlu0 %319 }
 0x2ec   : > { %1679 = vpow2.f32 %v707_v45  ;;  %322 = vst.msk [vmem:[#allocation4] sm:$0xff] %vm312_vm2, %v320_v47  ;;  %v334_v48 = vpop.permute.xlu1 %333 }
 0x2ed   : > { %1681 = vpow2.f32 %v709_v46  ;;  %337 = vst.msk [vmem:[#allocation4 + $0x8] sm:$0xff] %vm312_vm2, %v334_v48 }
 0x2f1   : > { %v1676_v49 = vpop.eup %1675 }
 0x2f2   : > { %v711_v50 = vsel %vm312_vm2, %v1676_v49, 0.0 }
 0x2f3   : > { %712 = vadd.xlane.f32.xlu0 %v711_v50  ;;  %v378_v51 = vld [vmem:[#allocation4] sm:$0xff] }
 0x2f4   : > { %1538 = vmatpush3.msra.mxu0 %v378_v51  ;;  %v379_v52 = vld [vmem:[#allocation4 + $0x8] sm:$0xff] }
 0x2f5   : > { %v1678_v53 = vpop.eup %1677  ;;  %1543 = vmatpush3.msra.mxu1 %v379_v52  ;;  %1547 = vmatprep.subr.mxu0 %v1862_v0 }
 0x2f6   : > { %v714_v54 = vsel %vm312_vm2, %v1678_v53, 0.0  ;;  %1552 = vmatprep.subr.mxu1 %v1862_v0 }
 0x2f7   : > { %715 = vadd.xlane.f32.xlu1 %v714_v54 }
 0x2f9   : > { %v1680_v55 = vpop.eup %1679 }
 0x2fa   : > { %v1682_v56 = vpop.eup %1681  ;;  %v717_v57 = vsel %vm312_vm2, %v1680_v55, 0.0 }
 0x2fb   : > { %718 = vadd.xlane.f32.xlu0 %v717_v57  ;;  %v720_v58 = vsel %vm312_vm2, %v1682_v56, 0.0 }
 0x2fc   : > { %721 = vadd.xlane.f32.xlu1 %v720_v58 }
 0x30d   : > { %348 = vrot.lane.b32.xlu1 %v2045_v6, %s1873_s9 }
 0x311   : > { %363 = vrot.lane.b32.xlu0 %v2045_v6, %s1874_s10 }
 0x37c   : > { %v713_v59 = vpop.xlane.xlu0 %712 }
 0x37d   : > { %1683 = vrcp.f32 %v713_v59 }
 0x380   : > { %v716_v60 = vpop.xlane.xlu1 %715 }
 0x381   : > { %1685 = vrcp.f32 %v716_v60 }
 0x384   : > { %v719_v61 = vpop.xlane.xlu0 %718 }
 0x385   : > { %1687 = vrcp.f32 %v719_v61  ;;  %v722_v62 = vpop.xlane.xlu1 %721 }
 0x386   : > { %1689 = vrcp.f32 %v722_v62 }
 0x388   : > { %v364_v63 = vpop.permute.xlu0 %363 }
 0x389   : > { %367 = vst.msk [vmem:[#allocation4 + $0x18] sm:$0xff] %vm312_vm2, %v364_v63  ;;  %v349_v1 = vpop.permute.xlu1 %348 }
 0x38a   : > { %v1684_v2 = vpop.eup %1683  ;;  %352 = vst.msk [vmem:[#allocation4 + $0x10] sm:$0xff] %vm312_vm2, %v349_v1 }
 0x38b   : > { %v727_v3 = vmul.f32 %v1684_v2, %v1676_v49 }
 0x38d   : > { %1540 = vmatmul.mubr.msk.f32.vlgmr.msra.gmra.mxu0 %vm312_vm2, %v727_v3 }
 0x38e   : > { %v1686_v4 = vpop.eup %1685  ;;  %1549 = vmatprep.mubr.msk.f32.mxu0 %vm1863_vm0, %v1862_v0 }
 0x38f   : > { %v728_v5 = vmul.f32 %v1686_v4, %v1678_v53 }
 0x390   : > { %v381_v6 = vld [vmem:[#allocation4 + $0x18] sm:$0xff] }
 0x391   : > { %1545 = vmatmul.mubr.msk.f32.vlgmr.msra.gmra.mxu1 %vm312_vm2, %v728_v5  ;;  %v380_v7 = vld [vmem:[#allocation4 + $0x10] sm:$0xff] }
 0x392   : > { %v1688_v8 = vpop.eup %1687  ;;  %1553 = vmatpush3.msra.mxu1 %v381_v6  ;;  %1548 = vmatpush3.msra.mxu0 %v380_v7 }
 0x393   : > { %v1690_v9 = vpop.eup %1689  ;;  %v729_v10 = vmul.f32 %v1688_v8, %v1680_v55  ;;  %1554 = vmatprep.mubr.msk.f32.mxu1 %vm1863_vm0, %v1862_v0  ;;  %1557 = vmatprep.subr.mxu0 %v1862_v0 }
 0x394   : > { %v730_v11 = vmul.f32 %v1690_v9, %v1682_v56  ;;  %1562 = vmatprep.subr.mxu1 %v1862_v0 }
 0x395   : > { %1550 = vmatmul.mubr.msk.f32.vlgmr.msra.gmra.mxu0 %vm312_vm2, %v729_v10 }
 0x396   : > { %1555 = vmatmul.mubr.msk.f32.vlgmr.msra.gmra.mxu1 %vm312_vm2, %v730_v11  ;;  %1559 = vmatprep.mubr.msk.f32.mxu0 %vm1863_vm0, %v1862_v0 }
 0x397   : > { %1564 = vmatprep.mubr.msk.f32.mxu1 %vm1863_vm0, %v1862_v0  ;;  %1558 = vmatpush3.msra.mxu0 %v1023_v12 }
 0x398   : > { %1567 = vmatprep.subr.mxu0 %v1862_v0  ;;  %1563 = vmatpush3.msra.mxu1 %v1024_v13 }
 0x399   : > { %1572 = vmatprep.subr.mxu1 %v1862_v0 }
 0x44d   : > { %v800_v15 = vpop.f32.mrf.mxu0 }
 0x44e   : > { %1560 = vmatmul.mubr.msk.f32.vlgmr.msra.gmra.mxu0 %vm312_vm2, %v800_v15 }
 0x44f   : > { %v1541_v16 = vpop.f32.mrf.mxu0  ;;  %1568 = vmatpush3.msra.mxu0 %v1025_v14  ;;  %1569 = vmatprep.mubr.msk.f32.mxu0 %vm1863_vm0, %v1862_v0 }
 0x451   : > { %v873_v18 = vpop.f32.mrf.mxu1 }
 0x452   : > { %1565 = vmatmul.mubr.msk.f32.vlgmr.msra.gmra.mxu1 %vm312_vm2, %v873_v18 }
 0x453   : > { %v1546_v19 = vpop.f32.mrf.mxu1  ;;  %1573 = vmatpush3.msra.mxu1 %v1026_v17  ;;  %1574 = vmatprep.mubr.msk.f32.mxu1 %vm1863_vm0, %v1862_v0 }
 0x455   : > { %v946_v20 = vpop.f32.mrf.mxu0 }
 0x456   : > { %v1019_v21 = vpop.f32.mrf.mxu1  ;;  %1570 = vmatmul.mubr.msk.f32.vlgmr.msra.gmra.mxu0 %vm312_vm2, %v946_v20 }
 0x457   : > { %v1551_v22 = vpop.f32.mrf.mxu0  ;;  %1575 = vmatmul.mubr.msk.f32.vlgmr.msra.gmra.mxu1 %vm312_vm2, %v1019_v21 }
 0x458   : > { %v1556_v23 = vpop.f32.mrf.mxu1 }
 0x50e   : > { %v1096_v24 = vpop.f32.mrf.mxu0 }
 0x50f   : > { %v1320_v29 = vsel %vm238_vm1, %v1096_v24, 0.0 }
 0x510   : > { %v1561_v25 = vpop.f32.mrf.mxu0 }
 0x512   : > { %v1169_v26 = vpop.f32.mrf.mxu1 }
 0x513   : > { %v1321_v27 = vsel %vm238_vm1, %v1169_v26, 0.0 }
 0x514   : > { %v1566_v28 = vpop.f32.mrf.mxu1  ;;  %v1322_v0 = vadd.f32 %v1321_v27, %v1320_v29 }
 0x516   : > { %v1242_v30 = vpop.f32.mrf.mxu0 }
 0x517   : > { %v1323_v31 = vsel %vm238_vm1, %v1242_v30, 0.0  ;;  %v1315_v32 = vpop.f32.mrf.mxu1 }
 0x518   : > { %v1324_v33 = vadd.f32 %v1323_v31, %v1322_v0  ;;  %v1325_v34 = vsel %vm238_vm1, %v1315_v32, 0.0  ;;  %v1571_v35 = vpop.f32.mrf.mxu0 }
 0x519   : > { %v1576_v36 = vpop.f32.mrf.mxu1 }
 0x51a   : > { %v1326_v37 = vadd.f32 %v1325_v34, %v1324_v33 }
 0x51c   : > { %1327 = vst.msk [vmem:[%s228_s25] sm:$0xff] %vm238_vm1, %v1326_v37 }
 0x51d   : > { %1784 = shalt.err (!%p1781_p5)
}
 0x51e   : > { %s1785_s6 = scalar_lea.hbm %s1341_s22, 128  ;;  %s1789_s21 = scalar_lea.hbm %s2175_s3, 256 }
 0x51f   : > { %p1786_p10 = scmp.ne.s32.totalorder %s1341_s22, %s1785_s6  ;;  %p1790_p6 = scmp.lt.s32.totalorder %s1341_s22, %s2175_s3 }
 0x520   : > { %p1791_p12 = scmp.lt.s32.totalorder %s1789_s21, %s1785_s6 }
 0x521   : > { %p1787_p1 = pnand %p1786_p10, %p1991_p7 }
 0x522   : > { %p1792_p3 = por %p1791_p12, %p1790_p6 }
 0x523   : > { %p1788_p4 = pneg %p1787_p1 }
 0x525   : > { %p1793_p8 = pnand %p1792_p3, %p1788_p4 }
 0x527   : > { %1796 = shalt.err (!%p1793_p8)
}
 0x528   : > { %1587 = dma.vmem_to_hbm [thread:$0]  (%p1991_p7), %s1344_s28, 128, %s1341_s22, %s1329_s24  }
 0x529 PF: > { %s1355_s10 = sand.u32 1, %s1835_s12   ;;  %p2189_p9 = scmp.ne.s32.totalorder %s2182_s23, 0 }
 0x52a   : > { %p2190_p11 = scmp.ge.s32.totalorder %s1855_s17, 2  ;;  %s1356_s18 = scalar_lea.sflag [#allocation7], %s1355_s10 }
 0x52c   : > { %p1601_p2 = pnand %p2190_p11, %p2189_p9 }
 0x52e   : > { %p1602_p13 = pneg %p1601_p2 }
 0x530   : > { %1830 = dma.done.wait (%p1602_p13), %s1356_s18, 128  }
 0x531   : > { %1832 = vsyncadd (%p1602_p13), %s1356_s18, 4294967168  ;;  %s20_s17 = sadd.s32 1, %s1855_s17   ;;  %s2191_s12 = smov %s1839_s13 }
 0x532   : > { %p17_p0 = scmp.ge.s32.totalorder %s20_s17, 4   ;;  %s2192_s13 = smov %s1843_s14 }
 0x533   : > { %s2193_s14 = smov %s2000_s29  ;;  %s2194_s15 = smov %s1851_s16 }
 0x534   : > { %s2195_s16 = smov %s2197_s11  ;;  %19 = sbr.rel (!%p17_p0) target bundleno = 7 (0x7), region = 99 }
 0x539   :  { %1361 = vsyncpa [#allocation6], 1 }
 0x53a   :  { %1363 = vsyncpa [#allocation6 + $0x1], 1 }
 0x53b   :  { %1364 = vsyncpa [#allocation9], 1 }
 0x53c   :  { %1365 = vsyncpa [#allocation7], 1 }
 0x53d   :  { %1367 = vsyncpa [#allocation7 + $0x1], 1 }

</bundles_post_ra>
